<compile_context>
chip_gen: v5e
topology: v5e:2x2
jax: 0.10.0
libtpu: 0.0.40
codegen_flags: <defaults>
</compile_context>

<pallas_src>
import functools

import jax
import jax.numpy as jnp
from jax.experimental import pallas as pl
from jax.experimental.pallas import tpu as pltpu


def _triplet_loss_kernel(tgt_sm, neg_sm,              # SMEM scalar-prefetch refs (B,)
                         x_ref, tgtrow_ref, emb_hbm,  # inputs: (TB,D) VMEM, (1,TB) VMEM, (V,D) HBM
                         out_ref,                     # output: (1,TB) VMEM
                         pos_buf, neg_buf, sem,       # scratch: (TB,D), (TB,D), DMA sems (2,)
                         *, margin, pad_idx, mode, tb):
    base = pl.program_id(0) * tb

    # ---- gather: DMA the 2*tb embedding rows this batch tile needs from HBM ----
    @pl.loop(0, tb)
    def _(r):
        p_idx = tgt_sm[base + r]
        n_idx = neg_sm[base + r]
        pltpu.make_async_copy(emb_hbm.at[p_idx], pos_buf.at[r], sem.at[0]).start()
        pltpu.make_async_copy(emb_hbm.at[n_idx], neg_buf.at[r], sem.at[1]).start()

    @pl.loop(0, tb)
    def _(r):
        # All row copies have identical size; dummy src index is fine for wait.
        pltpu.make_async_copy(emb_hbm.at[0], pos_buf.at[r], sem.at[0]).wait()
        pltpu.make_async_copy(emb_hbm.at[0], neg_buf.at[r], sem.at[1]).wait()

    # ---- per-row triplet loss (pure VPU/XLU, no MXU) ----
    x = x_ref[...].astype(jnp.float32)            # (tb, D)
    pos = pos_buf[...].astype(jnp.float32)        # (tb, D)
    neg = neg_buf[...].astype(jnp.float32)        # (tb, D)

    d_xp = jnp.sum(x * pos, axis=-1)              # (tb,)  == torch.bmm row dots
    d_xn = jnp.sum(x * neg, axis=-1)              # (tb,)

    if mode == 'dot':
        tl = jnp.maximum(-(d_xp - d_xn + margin), 0.0)          # relu(-triplet_loss)
    else:  # 'l2' : x·x cancels in dist(x,pos) - dist(x,neg)
        p_pp = jnp.sum(pos * pos, axis=-1)
        n_nn = jnp.sum(neg * neg, axis=-1)
        tl = jnp.maximum(p_pp - n_nn - 2.0 * (d_xp - d_xn) + margin, 0.0)

    # masked_fill(targets == pad_idx, 0); store lane-dense (1, tb)
    pad_mask = tgtrow_ref[...] == pad_idx                        # (1, tb)
    out_ref[...] = jnp.where(pad_mask, 0.0, tl.reshape(1, tb))


def triplet_loss_forward(x, targets, embedding, neg_ids, *,
                         margin=0.0, pad_idx=0, mode='dot', block_b=128):
    """x: [B, D] anchors; targets/neg_ids: [B] int; embedding: [V, D] (f32 or bf16)."""
    assert mode in ('dot', 'l2')
    B, D = x.shape
    V, D2 = embedding.shape
    assert D == D2

    tb = block_b
    pad_b = pl.cdiv(B, tb) * tb
    tgt = targets.astype(jnp.int32)
    neg = neg_ids.astype(jnp.int32)
    if pad_b != B:
        x = jnp.pad(x, ((0, pad_b - B), (0, 0)))
        tgt = jnp.pad(tgt, (0, pad_b - B), constant_values=pad_idx)  # padded rows mask to 0
        neg = jnp.pad(neg, (0, pad_b - B), constant_values=pad_idx)  # any valid row id
    tgt_row = tgt.reshape(1, pad_b)  # tiny lane-dense copy, used only for the pad mask

    kernel = functools.partial(_triplet_loss_kernel,
                               margin=float(margin), pad_idx=int(pad_idx),
                               mode=mode, tb=tb)

    out = pl.pallas_call(
        kernel,
        out_shape=jax.ShapeDtypeStruct((1, pad_b), jnp.float32),
        grid_spec=pltpu.PrefetchScalarGridSpec(
            num_scalar_prefetch=2,                # targets, neg_ids -> SMEM
            grid=(pad_b // tb,),
            in_specs=[
                pl.BlockSpec((tb, D), lambda i, t, n: (i, 0)),   # anchors x (pipelined)
                pl.BlockSpec((1, tb), lambda i, t, n: (0, i)),   # lane-dense targets (pad mask)
                pl.BlockSpec(memory_space=pl.ANY),               # embedding table stays in HBM
            ],
            out_specs=pl.BlockSpec((1, tb), lambda i, t, n: (0, i)),
            scratch_shapes=[
                pltpu.VMEM((tb, D), embedding.dtype),            # gathered pos rows
                pltpu.VMEM((tb, D), embedding.dtype),            # gathered neg rows
                pltpu.SemaphoreType.DMA((2,)),
            ],
        ),
        compiler_params=pltpu.CompilerParams(
            dimension_semantics=("parallel",),                   # B tiles independent (megacore on v7x)
        ),
    )(tgt, neg, x, tgt_row, embedding)
    return out.reshape(pad_b)[:B]


def _reference(x, targets, embedding, neg_ids, *, margin=0.0, pad_idx=0, mode='dot'):
    pos = embedding[targets]
    neg = embedding[neg_ids]
    dot = lambda a, b: jnp.sum(a * b, axis=-1)
    if mode == 'dot':
        tl = dot(x, pos) - dot(x, neg) + margin
        tl = jnp.maximum(-tl, 0.0)
    else:
        dist = lambda a, b: dot(a, a) + dot(b, b) - 2 * dot(a, b)
        tl = jnp.maximum(dist(x, pos) - dist(x, neg) + margin, 0.0)
    return jnp.where(targets == pad_idx, 0.0, tl)


if __name__ == "__main__":
    # B deliberately not a multiple of the 128-row batch tile to exercise padding.
    B, D, V = 200, 32, 512
    PAD_IDX = 0
    MARGIN = 0.1
    # TODO(synk): neg_sampling='hard' (argsort over anchor·vocab scores) is left to
    # plain JAX glue; only the module's default 'random' sampling is exercised here.

    key = jax.random.PRNGKey(0)
    k_x, k_emb, k_tgt, k_neg = jax.random.split(key, 4)

    x = jax.random.normal(k_x, (B, D), dtype=jnp.float32)
    embedding = jax.random.normal(k_emb, (V, D), dtype=jnp.float32) * 0.1
    targets = jax.random.randint(k_tgt, (B,), 0, V, dtype=jnp.int32)
    targets = targets.at[0].set(PAD_IDX)            # exercise the pad-masking path
    # torch.randint_like(targets, low=pad_idx+1, high=vocab_size)
    neg_ids = jax.random.randint(k_neg, (B,), PAD_IDX + 1, V, dtype=jnp.int32)

    for mode in ('dot', 'l2'):
        loss = triplet_loss_forward(x, targets, embedding, neg_ids,
                                    margin=MARGIN, pad_idx=PAD_IDX, mode=mode)
        loss = jax.block_until_ready(loss)
        ref = _reference(x, targets, embedding, neg_ids,
                         margin=MARGIN, pad_idx=PAD_IDX, mode=mode)
        assert loss.shape == (B,)
        assert jnp.allclose(loss, ref, atol=1e-4, rtol=1e-4), (mode, loss, ref)

    print("KERNEL_OK")
</pallas_src>

<mosaic_0001>
module attributes {stable_mosaic.version = 11 : i64} {
  func.func @_triplet_loss_kernel(%arg0: i32, %arg1: memref<256xi32, #tpu.memory_space<smem>>, %arg2: memref<256xi32, #tpu.memory_space<smem>>, %arg3: memref<128x32xf32, #tpu.memory_space<vmem>>, %arg4: memref<1x128xi32, #tpu.memory_space<vmem>>, %arg5: memref<512x32xf32, #tpu.memory_space<any>>, %arg6: memref<1x128xf32, #tpu.memory_space<vmem>>, %arg7: memref<128x32xf32, #tpu.memory_space<vmem>>, %arg8: memref<128x32xf32, #tpu.memory_space<vmem>>, %arg9: memref<2x!tpu.dma_semaphore, #tpu.memory_space<semaphore_mem>>) attributes {dimension_semantics = [#tpu.dimension_semantics<parallel>], iteration_bounds = array<i64: 2>, scalar_prefetch = 2 : i64, scratch_operands = 3 : i64, tpu.core_type = #tpu.core_type<tc>, window_params = [{transform_indices = @transform_0, window_bounds = array<i64: 128, 32>}, {transform_indices = @transform_1, window_bounds = array<i64: 1, 128>}, {}, {transform_indices = @transform_3, window_bounds = array<i64: 1, 128>}]} {
    %c128_i32 = arith.constant 128 : i32
    %0 = arith.muli %arg0, %c128_i32 : i32
    %c0_i32 = arith.constant 0 : i32
    %c128_i32_0 = arith.constant 128 : i32
    %1 = arith.addi %c0_i32, %c128_i32_0 : i32
    %c1_i32 = arith.constant 1 : i32
    scf.for %arg10 = %c0_i32 to %1 step %c1_i32  : i32 {
      %c1_i32_21 = arith.constant 1 : i32
      %24 = arith.muli %arg10, %c1_i32_21 : i32
      %c0_i32_22 = arith.constant 0 : i32
      %25 = arith.addi %c0_i32_22, %24 : i32
      %26 = arith.addi %0, %25 : i32
      %27 = arith.index_cast %26 : i32 to index
      %28 = memref.load %arg1[%27] : memref<256xi32, #tpu.memory_space<smem>>
      %29 = arith.addi %0, %25 : i32
      %30 = arith.index_cast %29 : i32 to index
      %31 = memref.load %arg2[%30] : memref<256xi32, #tpu.memory_space<smem>>
      %c0_i32_23 = arith.constant 0 : i32
      %c0_i32_24 = arith.constant 0 : i32
      %32 = tpu.memref_slice %arg5[%28, %c0_i32_24] : memref<512x32xf32, #tpu.memory_space<any>> -> memref<1x32xf32, #tpu.memory_space<any>>
      %33 = tpu.memref_squeeze %32 : memref<1x32xf32, #tpu.memory_space<any>> -> memref<32xf32, #tpu.memory_space<any>>
      %c0_i32_25 = arith.constant 0 : i32
      %34 = tpu.memref_slice %arg7[%25, %c0_i32_25] : memref<128x32xf32, #tpu.memory_space<vmem>> -> memref<1x32xf32, #tpu.memory_space<vmem>>
      %35 = tpu.memref_squeeze %34 : memref<1x32xf32, #tpu.memory_space<vmem>> -> memref<32xf32, #tpu.memory_space<vmem>>
      %36 = tpu.memref_slice %arg9[%c0_i32_23] : memref<2x!tpu.dma_semaphore, #tpu.memory_space<semaphore_mem>> -> memref<1x!tpu.dma_semaphore, #tpu.memory_space<semaphore_mem>>
      %37 = tpu.memref_squeeze %36 : memref<1x!tpu.dma_semaphore, #tpu.memory_space<semaphore_mem>> -> memref<!tpu.dma_semaphore, #tpu.memory_space<semaphore_mem>>
      tpu.enqueue_dma source(%33 : memref<32xf32, #tpu.memory_space<any>>) target(%35 : memref<32xf32, #tpu.memory_space<vmem>>) target_semaphore(%37 : memref<!tpu.dma_semaphore, #tpu.memory_space<semaphore_mem>>)
      %c1_i32_26 = arith.constant 1 : i32
      %c0_i32_27 = arith.constant 0 : i32
      %38 = tpu.memref_slice %arg5[%31, %c0_i32_27] : memref<512x32xf32, #tpu.memory_space<any>> -> memref<1x32xf32, #tpu.memory_space<any>>
      %39 = tpu.memref_squeeze %38 : memref<1x32xf32, #tpu.memory_space<any>> -> memref<32xf32, #tpu.memory_space<any>>
      %c0_i32_28 = arith.constant 0 : i32
      %40 = tpu.memref_slice %arg8[%25, %c0_i32_28] : memref<128x32xf32, #tpu.memory_space<vmem>> -> memref<1x32xf32, #tpu.memory_space<vmem>>
      %41 = tpu.memref_squeeze %40 : memref<1x32xf32, #tpu.memory_space<vmem>> -> memref<32xf32, #tpu.memory_space<vmem>>
      %42 = tpu.memref_slice %arg9[%c1_i32_26] : memref<2x!tpu.dma_semaphore, #tpu.memory_space<semaphore_mem>> -> memref<1x!tpu.dma_semaphore, #tpu.memory_space<semaphore_mem>>
      %43 = tpu.memref_squeeze %42 : memref<1x!tpu.dma_semaphore, #tpu.memory_space<semaphore_mem>> -> memref<!tpu.dma_semaphore, #tpu.memory_space<semaphore_mem>>
      tpu.enqueue_dma source(%39 : memref<32xf32, #tpu.memory_space<any>>) target(%41 : memref<32xf32, #tpu.memory_space<vmem>>) target_semaphore(%43 : memref<!tpu.dma_semaphore, #tpu.memory_space<semaphore_mem>>)
    }
    %c128_i32_1 = arith.constant 128 : i32
    %c0_i32_2 = arith.constant 0 : i32
    %c128_i32_3 = arith.constant 128 : i32
    %2 = arith.addi %c0_i32_2, %c128_i32_3 : i32
    %c1_i32_4 = arith.constant 1 : i32
    scf.for %arg10 = %c0_i32_2 to %2 step %c1_i32_4  : i32 {
      %c1_i32_21 = arith.constant 1 : i32
      %24 = arith.muli %arg10, %c1_i32_21 : i32
      %c0_i32_22 = arith.constant 0 : i32
      %25 = arith.addi %c0_i32_22, %24 : i32
      %c0_i32_23 = arith.constant 0 : i32
      %c0_i32_24 = arith.constant 0 : i32
      %c0_i32_25 = arith.constant 0 : i32
      %26 = tpu.memref_slice %arg5[%c0_i32_23, %c0_i32_25] : memref<512x32xf32, #tpu.memory_space<any>> -> memref<1x32xf32, #tpu.memory_space<any>>
      %27 = tpu.memref_squeeze %26 : memref<1x32xf32, #tpu.memory_space<any>> -> memref<32xf32, #tpu.memory_space<any>>
      %c0_i32_26 = arith.constant 0 : i32
      %28 = tpu.memref_slice %arg7[%25, %c0_i32_26] : memref<128x32xf32, #tpu.memory_space<vmem>> -> memref<1x32xf32, #tpu.memory_space<vmem>>
      %29 = tpu.memref_squeeze %28 : memref<1x32xf32, #tpu.memory_space<vmem>> -> memref<32xf32, #tpu.memory_space<vmem>>
      %30 = tpu.memref_slice %arg9[%c0_i32_24] : memref<2x!tpu.dma_semaphore, #tpu.memory_space<semaphore_mem>> -> memref<1x!tpu.dma_semaphore, #tpu.memory_space<semaphore_mem>>
      %31 = tpu.memref_squeeze %30 : memref<1x!tpu.dma_semaphore, #tpu.memory_space<semaphore_mem>> -> memref<!tpu.dma_semaphore, #tpu.memory_space<semaphore_mem>>
      tpu.wait_dma2 semaphore(%31 : memref<!tpu.dma_semaphore, #tpu.memory_space<semaphore_mem>>) src(%27 : memref<32xf32, #tpu.memory_space<any>>) dst(%29 : memref<32xf32, #tpu.memory_space<vmem>>)
      %c0_i32_27 = arith.constant 0 : i32
      %c1_i32_28 = arith.constant 1 : i32
      %c0_i32_29 = arith.constant 0 : i32
      %32 = tpu.memref_slice %arg5[%c0_i32_27, %c0_i32_29] : memref<512x32xf32, #tpu.memory_space<any>> -> memref<1x32xf32, #tpu.memory_space<any>>
      %33 = tpu.memref_squeeze %32 : memref<1x32xf32, #tpu.memory_space<any>> -> memref<32xf32, #tpu.memory_space<any>>
      %c0_i32_30 = arith.constant 0 : i32
      %34 = tpu.memref_slice %arg8[%25, %c0_i32_30] : memref<128x32xf32, #tpu.memory_space<vmem>> -> memref<1x32xf32, #tpu.memory_space<vmem>>
      %35 = tpu.memref_squeeze %34 : memref<1x32xf32, #tpu.memory_space<vmem>> -> memref<32xf32, #tpu.memory_space<vmem>>
      %36 = tpu.memref_slice %arg9[%c1_i32_28] : memref<2x!tpu.dma_semaphore, #tpu.memory_space<semaphore_mem>> -> memref<1x!tpu.dma_semaphore, #tpu.memory_space<semaphore_mem>>
      %37 = tpu.memref_squeeze %36 : memref<1x!tpu.dma_semaphore, #tpu.memory_space<semaphore_mem>> -> memref<!tpu.dma_semaphore, #tpu.memory_space<semaphore_mem>>
      tpu.wait_dma2 semaphore(%37 : memref<!tpu.dma_semaphore, #tpu.memory_space<semaphore_mem>>) src(%33 : memref<32xf32, #tpu.memory_space<any>>) dst(%35 : memref<32xf32, #tpu.memory_space<vmem>>)
    }
    %c128_i32_5 = arith.constant 128 : i32
    %c0 = arith.constant 0 : index
    %c0_6 = arith.constant 0 : index
    %3 = vector.load %arg3[%c0, %c0_6] : memref<128x32xf32, #tpu.memory_space<vmem>>, vector<128x32xf32>
    %c0_7 = arith.constant 0 : index
    %c0_8 = arith.constant 0 : index
    %4 = vector.load %arg7[%c0_7, %c0_8] : memref<128x32xf32, #tpu.memory_space<vmem>>, vector<128x32xf32>
    %c0_9 = arith.constant 0 : index
    %c0_10 = arith.constant 0 : index
    %5 = vector.load %arg8[%c0_9, %c0_10] : memref<128x32xf32, #tpu.memory_space<vmem>>, vector<128x32xf32>
    %6 = arith.mulf %3, %4 : vector<128x32xf32>
    %cst = arith.constant dense<0.000000e+00> : vector<128xf32>
    %7 = vector.multi_reduction <add>, %6, %cst [1] : vector<128x32xf32> to vector<128xf32>
    %8 = arith.mulf %3, %5 : vector<128x32xf32>
    %cst_11 = arith.constant dense<0.000000e+00> : vector<128xf32>
    %9 = vector.multi_reduction <add>, %8, %cst_11 [1] : vector<128x32xf32> to vector<128xf32>
    %10 = arith.subf %7, %9 : vector<128xf32>
    %cst_12 = arith.constant 1.000000e-01 : f32
    %11 = vector.broadcast %cst_12 : f32 to vector<128xf32>
    %12 = arith.addf %10, %11 : vector<128xf32>
    %cst_13 = arith.constant 0.000000e+00 : f32
    %13 = vector.broadcast %cst_13 : f32 to vector<128xf32>
    %14 = arith.subf %13, %12 : vector<128xf32>
    %cst_14 = arith.constant 0.000000e+00 : f32
    %15 = vector.broadcast %cst_14 : f32 to vector<128xf32>
    %16 = arith.maximumf %14, %15 : vector<128xf32>
    %c0_15 = arith.constant 0 : index
    %c0_16 = arith.constant 0 : index
    %17 = vector.load %arg4[%c0_15, %c0_16] : memref<1x128xi32, #tpu.memory_space<vmem>>, vector<1x128xi32>
    %c0_i32_17 = arith.constant 0 : i32
    %18 = vector.broadcast %c0_i32_17 : i32 to vector<1x128xi32>
    %19 = arith.cmpi eq, %17, %18 : vector<1x128xi32>
    %20 = vector.shape_cast %16 : vector<128xf32> to vector<1x128xf32>
    %cst_18 = arith.constant 0.000000e+00 : f32
    %21 = vector.broadcast %cst_18 : f32 to vector<1x128xf32>
    %22 = arith.select %19, %21, %20 : vector<1x128xi1>, vector<1x128xf32>
    %c0_19 = arith.constant 0 : index
    %c0_20 = arith.constant 0 : index
    %23 = vector.load %arg6[%c0_19, %c0_20] : memref<1x128xf32, #tpu.memory_space<vmem>>, vector<1x128xf32>
    tpu.vector_store %arg6[%c0_19, %c0_20], %22 {strides = array<i32>} : memref<1x128xf32, #tpu.memory_space<vmem>>, vector<1x128xf32>,
    return
  }
  func.func @transform_0(%arg0: i32, %arg1: memref<256xi32, #tpu.memory_space<smem>>, %arg2: memref<256xi32, #tpu.memory_space<smem>>) -> (i32, i32) {
    %c0_i32 = arith.constant 0 : i32
    %c0_i32_0 = arith.constant 0 : i32
    return %arg0, %c0_i32 : i32, i32
  }
  func.func @transform_1(%arg0: i32, %arg1: memref<256xi32, #tpu.memory_space<smem>>, %arg2: memref<256xi32, #tpu.memory_space<smem>>) -> (i32, i32) {
    %c0_i32 = arith.constant 0 : i32
    %c0_i32_0 = arith.constant 0 : i32
    return %c0_i32, %arg0 : i32, i32
  }
  func.func @transform_3(%arg0: i32, %arg1: memref<256xi32, #tpu.memory_space<smem>>, %arg2: memref<256xi32, #tpu.memory_space<smem>>) -> (i32, i32) {
    %c0_i32 = arith.constant 0 : i32
    %c0_i32_0 = arith.constant 0 : i32
    return %c0_i32, %arg0 : i32, i32
  }
}

</mosaic_0001>

<bundles_post_ra>
// kernel: tpu_custom_call.1
= control target key start
LH: loop header
LB: loop body
LE: loop exit
PB: predicated region body
PF: predicated region fallthrough
CT: control target
= control target key end

     0   :  { %s1213_s24 = smov [#allocation6]   ;;  %s1214_s25 = smov [#allocation7]   ;;  %s1414_s0 = inlined_call_operand.vmem [shape: s32[256], index: 0, kind: input, shape index: {}]   ;;  %s1415_s2 = inlined_call_operand.vmem [shape: f32[256,32], index: 2, kind: input, shape index: {}]   ;;  %s1416_s3 = inlined_call_operand.vmem [shape: s32[1,256], index: 3, kind: input, shape index: {}]   ;;  %s1417_s4 = inlined_call_operand.vmem [shape: f32[512,32], index: 4, kind: input, shape index: {}]   ;;  %s1418_s5 = inlined_call_operand.hbm [shape: f32[1,256], index: 5, kind: output, shape index: {}]   ;;  %s1419_s1 = inlined_call_operand.vmem [shape: s32[256], index: 1, kind: input, shape index: {}]  }
   0x1   :  { %s11_s20 = sshll.u32 %s1414_s0, 4  ;;  %s16_s23 = sshll.u32 %s1419_s1, 4  ;;  %s12_s20 = int_to_ptr.vmem [resolvable:$true] %s11_s20  ;;  %s17_s23 = int_to_ptr.vmem [resolvable:$true] %s16_s23 }
   0x2   :  { %14 = dma.vmem_to_smem %s12_s20, 32, %s1213_s24, [#allocation5] }
   0x3   :  { %19 = dma.vmem_to_smem %s17_s23, 32, %s1214_s25, [#allocation5] }
   0x4   :  { %1179 = dma.done.wait [#allocation5], 64 }
   0x5   :  { %1180 = vsyncadd [#allocation5], 4294967232 }
   0x6   :  { %22 = sfence }
   0x7   :  { %23 = vsyncpa [#allocation9], 0 }
   0x8   :  { %25 = vsyncpa [#allocation9 + $0x1], 0  ;;  %s1252_s26 = smov 0   ;;  %s1254_s27 = smov 0  }
   0x9   :  { %s1256_s0 = smov 0   ;;  %s1258_s28 = smov 0  }
   0xa LB: > { %s1273_s1 = sadd.s32 4294967295, %s1203_s28   ;;  %s1031_s29 = sadd.s32 4294967294, %s1203_s28   ;;  %s1203_s28 = sphi %s1258_s28, %s1425_s28   ;;  %s1199_s0 = sphi %s1256_s0, %s1424_s0   ;;  %s1195_s27 = sphi %s1254_s27, %s1423_s27   ;;  %s1191_s26 = sphi %s1252_s26, %s1422_s26  }
   0xb   : > { %s1277_s30 = sadd.s32 1, %s1203_s28   ;;  %s90_s6 = sadd.s32 1, %s1199_s0 }
   0xc   : > { %s87_s7 = ssub.s32 %s1203_s28, %s1277_s30  ;;  %p100_p0 = scmp.ne.s32.totalorder %s1199_s0, %s1195_s27 }
   0xd   : > { %p88_p1 = scmp.eq.s32.totalorder %s87_s7, 0  ;;  %p101_p2 = scmp.eq.s32.totalorder %s1273_s1, 1 }
   0xe   : > { %p106_p3 = scmp.ne.s32.totalorder %s1195_s27, %s1191_s26  ;;  %p107_p4 = scmp.eq.s32.totalorder %s1031_s29, 1 }
   0xf   : > { %s1288_s8 = scalar_select %p88_p1, %s1199_s0, %s90_s6  }
  0x10   : > { %p1290_p5 = por %p101_p2, %p100_p0  ;;  %p1294_p6 = por %p107_p4, %p106_p3 }
  0x11   : > { %p1034_p7 = scmp.ge.s32.totalorder %s1203_s28, 1  ;;  %p140_p8 = scmp.lt.s32.totalorder %s1203_s28, 3 }
  0x13   : > { %p141_p9 = pnand %p1034_p7, %p140_p8 }
  0x14   : > { %s162_s11 = sand.u32 (!%p141_p9), 1, %s1195_s27   ;;  %s1035_s12 = sshll.u32 (!%p141_p9), %s1273_s1, 4 }
  0x15   : > { %144 = sbr.rel (%p141_p9) target bundleno = 543 (0x21f), region = 28  ;;  %p165_p10 = scmp.lt.s32.totalorder (!%p141_p9), %s1035_s12, 31 }
  0x16   : > { %p170_p11 = scmp.lt.s32.totalorder (!%p141_p9), %s1273_s1, 1  ;;  %s1037_s13 = sshll.u32 (!%p141_p9), %s1273_s1, 7 }
  0x17   : > { %s1318_s22 = scalar_lea.vmem (!%p141_p9), [#allocation8], %s162_s11  ;;  %s1205_s23 = smov (!%p141_p9), 0  }
  0x1a   : > { %s1427_s12 = smov (!%p165_p10, %s1035_s12), 31 }
  0x1b   : > { %s1305_s14 = scalar_select %p170_p11, %s1273_s1, 1 }
  0x1c   : > { %s1036_s15 = sshll.u32 %s1427_s12, 3 }
  0x1d   : > { %s1310_s18 = scalar_lea.vmem %s1415_s2, %s1036_s15  ;;  %s172_s21 = scalar_lea.vmem %s1416_s3, %s1305_s14 }
  0x1e LB: >> { %s180_s24 = sadd.s32 %s1207_s23, %s1037_s13  ;;  %s184_s15 = scalar_lea.vmem [#allocation2], %s1207_s23  ;;  %s1207_s23 = sphi %s1205_s23, %s179_s23  }
  0x1f   : >> { %s181_s25 = sld [smem:[#allocation6 + %s180_s24]] }
  0x20   : >> { %s182_s29 = sld [smem:[#allocation7 + %s180_s24]] }
  0x25   : >> { %s183_s12 = scalar_lea.vmem %s1417_s4, %s181_s25 }
  0x26   : >> { %v199_v0 = vld [vmem:[%s183_s12] sm:$0x1] }
  0x27   : >> { %200 = vst [vmem:[%s184_s15] sm:$0x1] %v199_v0 }
  0x28   : >> { %218 = vsyncadd [#allocation4], 16  ;;  %s219_s19 = scalar_lea.vmem %s1417_s4, %s182_s29  ;;  %s220_s20 = scalar_lea.vmem [#allocation3], %s1207_s23 }
  0x29   : >> { %v236_v1 = vld [vmem:[%s219_s19] sm:$0x1] }
  0x2a   : >> { %237 = vst [vmem:[%s220_s20] sm:$0x1] %v236_v1 }
  0x2b   : >> { %255 = vsyncadd [#allocation4 + $0x1], 16  ;;  %s179_s23 = sadd.s32 1, %s1207_s23  }
  0x2c   : >> { %p176_p12 = scmp.ge.s32.totalorder %s179_s23, 128  }
  0x2d   : > { %s1209_s24 = smov (%p176_p12), 0  }
  0x2e   : > { %178 = sbr.rel (!%p176_p12) target bundleno = 30 (0x1e), region = 162 }
  0x33 LB: >> { %1181 = dma.done.wait [#allocation4], 16  ;;  %s1211_s24 = sphi %s1209_s24, %s261_s24  }
  0x34   : >> { %1182 = vsyncadd [#allocation4], 4294967280 }
  0x35   : >> { %1183 = dma.done.wait [#allocation4 + $0x1], 16 }
  0x36   : >> { %1184 = vsyncadd [#allocation4 + $0x1], 4294967280  ;;  %s261_s24 = sadd.s32 1, %s1211_s24  }
  0x37   : >> { %p258_p13 = scmp.ge.s32.totalorder %s261_s24, 128  }
  0x38   : > { %v268_v2 = vld [vmem:[%s1310_s18 + $0x8] sm:$0xff] (%p258_p13)  ;;  %v284_v3 = vld [vmem:[#allocation2 + $0x8] sm:$0xff] (%p258_p13)  ;;  %vm331_vm0 = vcmask (%p258_p13), 261120   ;;  %v267_v4 = vld [vmem:[%s1310_s18] sm:$0xff] (%p258_p13)  ;;  %vm858_vm1 = vcmask (%p258_p13), 130112   ;;  %vm862_vm2 = vcmask (%p258_p13), 195712   ;;  %s928_s23 = scalar_lea.hbm (%p258_p13), %s1418_s5, %s1273_s1 }
  0x39   : > { %260 = sbr.rel (!%p258_p13) target bundleno = 51 (0x33), region = 173  ;;  %v316_v5 = vmul.f32 (%p258_p13), %v284_v3, %v268_v2  ;;  %v283_v6 = vld [vmem:[#allocation2] sm:$0xff] (%p258_p13)  ;;  %v269_v7 = vld [vmem:[%s1310_s18 + $0x10] sm:$0xff] (%p258_p13)  ;;  %v285_v8 = vld [vmem:[#allocation2 + $0x10] sm:$0xff] (%p258_p13)  ;;  %vm866_vm3 = vcmask (%p258_p13), 261312   ;;  %vm870_vm4 = vcmask (%p258_p13), 326912  }
  0x3a   : > { %v315_v9 = vmul.f32 (%p258_p13), %v283_v6, %v267_v4  ;;  %v317_v10 = vmul.f32 (%p258_p13), %v285_v8, %v269_v7  ;;  %v300_v11 = vld [vmem:[#allocation3 + $0x8] sm:$0xff] (%p258_p13)  ;;  %v299_v13 = vld [vmem:[#allocation3] sm:$0xff] (%p258_p13)  ;;  %v301_v14 = vld [vmem:[#allocation3 + $0x10] sm:$0xff] (%p258_p13)  ;;  %vm874_vm5 = vcmask (%p258_p13), 392512   ;;  %vm878_vm6 = vcmask (%p258_p13), 458112   ;;  %s930_s6 = sshll.u32 (%p258_p13), %s1318_s22, 4  ;;  %s931_s6 = int_to_ptr.vmem [resolvable:$true] %s930_s6 }
  0x3b   : > { %v335_v12 = vsel (%p258_p13), %vm331_vm0, %v316_v5, 0.0  ;;  %v381_v17 = vmul.f32 (%p258_p13), %v300_v11, %v268_v2  ;;  %v380_v18 = vmul.f32 (%p258_p13), %v299_v13, %v267_v4  ;;  %v382_v19 = vmul.f32 (%p258_p13), %v301_v14, %v269_v7  ;;  %v270_v23 = vld [vmem:[%s1310_s18 + $0x18] sm:$0xff] (%p258_p13)  ;;  %v302_v24 = vld [vmem:[#allocation3 + $0x18] sm:$0xff] (%p258_p13)  ;;  %v287_v27 = vld [vmem:[#allocation2 + $0x20] sm:$0xff] (%p258_p13)  ;;  %s932_s7 = sshll.u32 (%p258_p13), %s928_s23, 4  ;;  %s920_s1 = scalar_lea.sflag (%p258_p13), [#allocation9], %s162_s11  ;;  %s933_s7 = int_to_ptr.hbm [resolvable:$true] %s932_s7 }
  0x3c   : > { %336 = vadd.xlane.f32.xlu1 (%p258_p13), %v335_v12  ;;  %v332_v15 = vsel (%p258_p13), %vm331_vm0, %v315_v9, 0.0  ;;  %v338_v16 = vsel (%p258_p13), %vm331_vm0, %v317_v10, 0.0  ;;  %v286_v25 = vld [vmem:[#allocation2 + $0x18] sm:$0xff] (%p258_p13)  ;;  %v383_v28 = vmul.f32 (%p258_p13), %v302_v24, %v270_v23  ;;  %v272_v34 = vld [vmem:[%s1310_s18 + $0x28] sm:$0xff] (%p258_p13)  ;;  %v288_v35 = vld [vmem:[#allocation2 + $0x28] sm:$0xff] (%p258_p13)  ;;  %vm882_vm7 = vcmask (%p258_p13), 523712  }
  0x3d   : > { %333 = vadd.xlane.f32.xlu0 (%p258_p13), %v332_v15  ;;  %339 = vadd.xlane.f32.xlu2 (%p258_p13), %v338_v16  ;;  %v399_v20 = vsel (%p258_p13), %vm331_vm0, %v381_v17, 0.0  ;;  %v396_v21 = vsel (%p258_p13), %vm331_vm0, %v380_v18, 0.0  ;;  %v402_v22 = vsel (%p258_p13), %vm331_vm0, %v382_v19, 0.0  ;;  %v271_v26 = vld [vmem:[%s1310_s18 + $0x20] sm:$0xff] (%p258_p13)  ;;  %v318_v29 = vmul.f32 (%p258_p13), %v286_v25, %v270_v23  ;;  %v303_v36 = vld [vmem:[#allocation3 + $0x20] sm:$0xff] (%p258_p13)  ;;  %v304_v37 = vld [vmem:[#allocation3 + $0x28] sm:$0xff] (%p258_p13) }
  0x3e   : > { %v319_v30 = vmul.f32 %v287_v27, %v271_v26  ;;  %v405_v31 = vsel %vm331_vm0, %v383_v28, 0.0  ;;  %v320_v38 = vmul.f32 %v288_v35, %v272_v34  ;;  %v384_v39 = vmul.f32 %v303_v36, %v271_v26  ;;  %v273_v44 = vld [vmem:[%s1310_s18 + $0x30] sm:$0xff]  ;;  %v305_v45 = vld [vmem:[#allocation3 + $0x30] sm:$0xff]  ;;  %v290_v48 = vld [vmem:[#allocation2 + $0x38] sm:$0xff]  ;;  %s1141_s14 = sshra.s32 %s933_s7, 4  ;;  %s1147_s16 = scalar_lea.hbm %s1418_s5, 2  ;;  %s1142_s14 = int_to_ptr.hbm [resolvable:$true] %s1141_s14 }
  0x3f   : > { %v341_v32 = vsel %vm331_vm0, %v318_v29, 0.0  ;;  %v385_v40 = vmul.f32 %v304_v37, %v272_v34  ;;  %v289_v46 = vld [vmem:[#allocation2 + $0x30] sm:$0xff]  ;;  %v386_v49 = vmul.f32 %v305_v45, %v273_v44  ;;  %v275_v55 = vld [vmem:[%s1310_s18 + $0x40] sm:$0xff]  ;;  %v291_v56 = vld [vmem:[#allocation2 + $0x40] sm:$0xff]  ;;  %vm886_vm8 = vcmask 589312   ;;  %p1148_p3 = scmp.lt.s32.totalorder %s1142_s14, %s1418_s5 }
  0x40   : > { %v344_v33 = vsel %vm331_vm0, %v319_v30, 0.0  ;;  %v347_v41 = vsel %vm331_vm0, %v320_v38, 0.0  ;;  %v408_v42 = vsel %vm331_vm0, %v384_v39, 0.0  ;;  %v274_v47 = vld [vmem:[%s1310_s18 + $0x38] sm:$0xff]  ;;  %v321_v50 = vmul.f32 %v289_v46, %v273_v44  ;;  %v306_v57 = vld [vmem:[#allocation3 + $0x38] sm:$0xff]  ;;  %v307_v58 = vld [vmem:[#allocation3 + $0x40] sm:$0xff] }
  0x41   : > { %v411_v43 = vsel %vm331_vm0, %v385_v40, 0.0  ;;  %v322_v51 = vmul.f32 %v290_v48, %v274_v47  ;;  %v414_v52 = vsel %vm331_vm0, %v386_v49, 0.0  ;;  %v323_v59 = vmul.f32 %v291_v56, %v275_v55  ;;  %v276_v1 = vld [vmem:[%s1310_s18 + $0x48] sm:$0xff]  ;;  %v308_v2 = vld [vmem:[#allocation3 + $0x48] sm:$0xff]  ;;  %v293_v5 = vld [vmem:[#allocation2 + $0x50] sm:$0xff] }
  0x42   : > { %v350_v53 = vsel %vm331_vm0, %v321_v50, 0.0  ;;  %v387_v60 = vmul.f32 %v306_v57, %v274_v47  ;;  %v388_v61 = vmul.f32 %v307_v58, %v275_v55  ;;  %v292_v3 = vld [vmem:[#allocation2 + $0x48] sm:$0xff]  ;;  %v389_v6 = vmul.f32 %v308_v2, %v276_v1  ;;  %v294_v12 = vld [vmem:[#allocation2 + $0x58] sm:$0xff]  ;;  %v309_v13 = vld [vmem:[#allocation3 + $0x50] sm:$0xff] }
  0x43   : > { %v353_v54 = vsel %vm331_vm0, %v322_v51, 0.0  ;;  %v356_v62 = vsel %vm331_vm0, %v323_v59, 0.0  ;;  %v277_v4 = vld [vmem:[%s1310_s18 + $0x50] sm:$0xff]  ;;  %v324_v7 = vmul.f32 %v292_v3, %v276_v1  ;;  %v278_v14 = vld [vmem:[%s1310_s18 + $0x58] sm:$0xff]  ;;  %v310_v15 = vld [vmem:[#allocation3 + $0x58] sm:$0xff]  ;;  %v1215_v58 = vmov 0  }
  0x44   : > { %400 = vadd.xlane.f32.xlu1 %v399_v20  ;;  %v417_v63 = vsel %vm331_vm0, %v387_v60, 0.0  ;;  %v420_v0 = vsel %vm331_vm0, %v388_v61, 0.0  ;;  %v325_v8 = vmul.f32 %v293_v5, %v277_v4  ;;  %v423_v9 = vsel %vm331_vm0, %v389_v6, 0.0  ;;  %v311_v23 = vld [vmem:[#allocation3 + $0x60] sm:$0xff]  ;;  %v296_v26 = vld [vmem:[#allocation2 + $0x68] sm:$0xff]  ;;  %v297_v35 = vld [vmem:[#allocation2 + $0x70] sm:$0xff]  ;;  %1100 = vset.pattern.permute.xlu2 %v1215_v58 }
  0x45   : > { %397 = vadd.xlane.f32.xlu0 %v396_v21  ;;  %403 = vadd.xlane.f32.xlu2 %v402_v22  ;;  %v359_v10 = vsel %vm331_vm0, %v324_v7, 0.0  ;;  %v326_v16 = vmul.f32 %v294_v12, %v278_v14  ;;  %v390_v17 = vmul.f32 %v309_v13, %v277_v4  ;;  %v391_v18 = vmul.f32 %v310_v15, %v278_v14  ;;  %v279_v22 = vld [vmem:[%s1310_s18 + $0x60] sm:$0xff]  ;;  %v295_v24 = vld [vmem:[#allocation2 + $0x60] sm:$0xff]  ;;  %v312_v34 = vld [vmem:[#allocation3 + $0x68] sm:$0xff] }
  0x46   : > { %v362_v11 = vsel %vm331_vm0, %v325_v8, 0.0  ;;  %v280_v25 = vld [vmem:[%s1310_s18 + $0x68] sm:$0xff]  ;;  %v392_v27 = vmul.f32 %v311_v23, %v279_v22  ;;  %v327_v28 = vmul.f32 %v295_v24, %v279_v22  ;;  %v282_v36 = vld [vmem:[%s1310_s18 + $0x78] sm:$0xff]  ;;  %v298_v37 = vld [vmem:[#allocation2 + $0x78] sm:$0xff]  ;;  %1101 = vset.pattern.permute.xlu0 %v1215_v58  ;;  %1102 = vset.pattern.permute.xlu1 %v1215_v58  ;;  %vm890_vm9 = vcmask 654912  }
  0x47   : > { %v365_v19 = vsel %vm331_vm0, %v326_v16, 0.0  ;;  %v426_v20 = vsel %vm331_vm0, %v390_v17, 0.0  ;;  %v429_v21 = vsel %vm331_vm0, %v391_v18, 0.0  ;;  %v328_v29 = vmul.f32 %v296_v26, %v280_v25  ;;  %v313_v44 = vld [vmem:[#allocation3 + $0x70] sm:$0xff]  ;;  %v314_v47 = vld [vmem:[#allocation3 + $0x78] sm:$0xff] }
  0x48   : > { %v432_v30 = vsel %vm331_vm0, %v392_v27, 0.0  ;;  %v393_v38 = vmul.f32 %v312_v34, %v280_v25  ;;  %v330_v40 = vmul.f32 %v298_v37, %v282_v36  ;;  %v395_v48 = vmul.f32 %v314_v47, %v282_v36 }
  0x49   : > { %vm894_vm10 = vcmask 720512   ;;  %vm898_vm11 = vcmask 786112   ;;  %vm902_vm12 = vcmask 851712   ;;  %vm906_vm13 = vcmask 917312  }
  0x4a   : > { %v441_v49 = vsel %vm331_vm0, %v395_v48, 0.0  ;;  %vm910_vm14 = vcmask 982912   ;;  %vm914_vm15 = vcmask 1048512  }
  0x4c   : > { %406 = vadd.xlane.f32.xlu1 %v405_v31  ;;  %v368_v31 = vsel %vm331_vm0, %v327_v28, 0.0 }
  0x4d   : > { %342 = vadd.xlane.f32.xlu0 %v341_v32  ;;  %345 = vadd.xlane.f32.xlu2 %v344_v33  ;;  %v371_v32 = vsel %vm331_vm0, %v328_v29, 0.0  ;;  %v281_v33 = vld [vmem:[%s1310_s18 + $0x70] sm:$0xff] }
  0x4e   : > { %v329_v39 = vmul.f32 %v297_v35, %v281_v33  ;;  %v394_v45 = vmul.f32 %v313_v44, %v281_v33 }
  0x50   : > { %v438_v46 = vsel %vm331_vm0, %v394_v45, 0.0 }
  0x54   : > { %348 = vadd.xlane.f32.xlu1 %v347_v41  ;;  %v435_v41 = vsel %vm331_vm0, %v393_v38, 0.0 }
  0x55   : > { %409 = vadd.xlane.f32.xlu0 %v408_v42  ;;  %412 = vadd.xlane.f32.xlu2 %v411_v43  ;;  %v374_v42 = vsel %vm331_vm0, %v329_v39, 0.0  ;;  %v377_v43 = vsel %vm331_vm0, %v330_v40, 0.0 }
  0x5c   : > { %415 = vadd.xlane.f32.xlu1 %v414_v52 }
  0x5d   : > { %351 = vadd.xlane.f32.xlu0 %v350_v53  ;;  %354 = vadd.xlane.f32.xlu2 %v353_v54 }
  0x64   : > { %357 = vadd.xlane.f32.xlu1 %v356_v62 }
  0x65   : > { %418 = vadd.xlane.f32.xlu0 %v417_v63  ;;  %421 = vadd.xlane.f32.xlu2 %v420_v0 }
  0x6c   : > { %424 = vadd.xlane.f32.xlu1 %v423_v9 }
  0x6d   : > { %360 = vadd.xlane.f32.xlu0 %v359_v10  ;;  %363 = vadd.xlane.f32.xlu2 %v362_v11 }
  0x74   : > { %366 = vadd.xlane.f32.xlu1 %v365_v19 }
  0x75   : > { %427 = vadd.xlane.f32.xlu0 %v426_v20  ;;  %430 = vadd.xlane.f32.xlu2 %v429_v21 }
  0x7c   : > { %433 = vadd.xlane.f32.xlu1 %v432_v30 }
  0x7d   : > { %369 = vadd.xlane.f32.xlu0 %v368_v31  ;;  %372 = vadd.xlane.f32.xlu2 %v371_v32 }
  0x84   : > { %436 = vadd.xlane.f32.xlu1 %v435_v41 }
  0x85   : > { %375 = vadd.xlane.f32.xlu0 %v374_v42  ;;  %378 = vadd.xlane.f32.xlu2 %v377_v43 }
  0x8c   : > { %442 = vadd.xlane.f32.xlu1 %v441_v49 }
  0x8d   : > { %439 = vadd.xlane.f32.xlu0 %v438_v46 }
  0xaf   : > { %v337_v51 = vpop.xlane.xlu1 %336 }
  0xb0   : > { %v334_v50 = vpop.xlane.xlu0 %333  ;;  %v340_v63 = vpop.xlane.xlu2 %339 }
  0xb7   : > { %v401_v56 = vpop.xlane.xlu1 %400 }
  0xb8   : > { %v398_v52 = vpop.xlane.xlu0 %397  ;;  %v445_v59 = vsub.f32 %v337_v51, %v401_v56  ;;  %v404_v8 = vpop.xlane.xlu2 %403 }
  0xb9   : > { %v444_v53 = vsub.f32 %v334_v50, %v398_v52  ;;  %v446_v9 = vsub.f32 %v340_v63, %v404_v8 }
  0xba   : > { %v461_v2 = vadd.f32 0.1, %v445_v59 }
  0xbb   : > { %v460_v54 = vadd.f32 0.1, %v444_v53  ;;  %v462_v15 = vadd.f32 0.1, %v446_v9 }
  0xbc   : > { %v477_v6 = vsub.f32 0.0, %v461_v2 }
  0xbd   : > { %v476_v55 = vsub.f32 0.0, %v460_v54  ;;  %v478_v20 = vsub.f32 0.0, %v462_v15 }
  0xbe   : > { %v493_v7 = vmax.f32 %v477_v6, 0.0 }
  0xbf   : > { %v492_v57 = vmax.f32 %v476_v55, 0.0  ;;  %v407_v21 = vpop.xlane.xlu1 %406  ;;  %v494_v23 = vmax.f32 %v478_v20, 0.0 }
  0xc0   : > { %v534_v10 = vperm.slane %v493_v7, 0  ;;  %v535_v11 = vperm.slane %v493_v7, 1  ;;  %v536_v13 = vperm.slane %v493_v7, 2  ;;  %v537_v14 = vperm.slane %v493_v7, 3  ;;  %v343_v22 = vpop.xlane.xlu0 %342  ;;  %v346_v37 = vpop.xlane.xlu2 %345 }
  0xc1   : > { %v526_v60 = vperm.slane %v492_v57, 0  ;;  %v527_v61 = vperm.slane %v492_v57, 1  ;;  %v528_v62 = vperm.slane %v492_v57, 2  ;;  %v529_v0 = vperm.slane %v492_v57, 3 }
  0xc2   : > { %v530_v1 = vperm.slane %v492_v57, 4  ;;  %v531_v3 = vperm.slane %v492_v57, 5  ;;  %v532_v4 = vperm.slane %v492_v57, 6  ;;  %v533_v5 = vperm.slane %v492_v57, 7 }
  0xc3   : > { %654 = vst [vmem:[#allocation1] ss:$9 sm:$0xff] %v526_v60  ;;  %v538_v16 = vperm.slane %v493_v7, 4  ;;  %v539_v17 = vperm.slane %v493_v7, 5  ;;  %v540_v18 = vperm.slane %v493_v7, 6  ;;  %v541_v19 = vperm.slane %v493_v7, 7 }
  0xc4   : > { %656 = vst [vmem:[#allocation1 + $0x1] ss:$9 sm:$0xff] %v527_v61  ;;  %v447_v24 = vsub.f32 %v343_v22, %v407_v21  ;;  %v542_v25 = vperm.slane %v494_v23, 0  ;;  %v543_v27 = vperm.slane %v494_v23, 1  ;;  %v544_v29 = vperm.slane %v494_v23, 2 }
  0xc5   : > { %658 = vst [vmem:[#allocation1 + $0x2] ss:$9 sm:$0xff] %v528_v62  ;;  %v545_v30 = vperm.slane %v494_v23, 3  ;;  %v546_v31 = vperm.slane %v494_v23, 4  ;;  %v547_v32 = vperm.slane %v494_v23, 5  ;;  %v548_v34 = vperm.slane %v494_v23, 6 }
  0xc6   : > { %660 = vst [vmem:[#allocation1 + $0x3] ss:$9 sm:$0xff] %v529_v0  ;;  %v463_v28 = vadd.f32 0.1, %v447_v24  ;;  %v549_v35 = vperm.slane %v494_v23, 7 }
  0xc7   : > { %662 = vst [vmem:[#allocation1 + $0x4] ss:$9 sm:$0xff] %v530_v1  ;;  %v349_v53 = vpop.xlane.xlu1 %348 }
  0xc8   : > { %664 = vst [vmem:[#allocation1 + $0x5] ss:$9 sm:$0xff] %v531_v3  ;;  %v479_v33 = vsub.f32 0.0, %v463_v28  ;;  %v410_v38 = vpop.xlane.xlu0 %409  ;;  %v413_v52 = vpop.xlane.xlu2 %412 }
  0xc9   : > { %666 = vst [vmem:[#allocation1 + $0x6] ss:$9 sm:$0xff] %v532_v4  ;;  %v448_v39 = vsub.f32 %v346_v37, %v410_v38  ;;  %v449_v54 = vsub.f32 %v349_v53, %v413_v52 }
  0xca   : > { %668 = vst [vmem:[#allocation1 + $0x7] ss:$9 sm:$0xff] %v533_v5  ;;  %v495_v36 = vmax.f32 %v479_v33, 0.0 }
  0xcb   : > { %v464_v45 = vadd.f32 0.1, %v448_v39  ;;  %v465_v60 = vadd.f32 0.1, %v449_v54 }
  0xcc   : > { %v550_v40 = vperm.slane %v495_v36, 0  ;;  %v551_v41 = vperm.slane %v495_v36, 1  ;;  %v552_v42 = vperm.slane %v495_v36, 2  ;;  %v553_v44 = vperm.slane %v495_v36, 3 }
  0xcd   : > { %v554_v46 = vperm.slane %v495_v36, 4  ;;  %v555_v47 = vperm.slane %v495_v36, 5  ;;  %v556_v48 = vperm.slane %v495_v36, 6  ;;  %v557_v49 = vperm.slane %v495_v36, 7 }
  0xce   : > { %v480_v50 = vsub.f32 0.0, %v464_v45  ;;  %v481_v1 = vsub.f32 0.0, %v465_v60 }
  0xcf   : > { %v416_v3 = vpop.xlane.xlu1 %415 }
  0xd0   : > { %v496_v51 = vmax.f32 %v480_v50, 0.0  ;;  %v497_v2 = vmax.f32 %v481_v1, 0.0  ;;  %v352_v4 = vpop.xlane.xlu0 %351 }
  0xd1   : > { %v669_v12 = vld [vmem:[#allocation1] sm:$0xff]  ;;  %v450_v5 = vsub.f32 %v352_v4, %v416_v3 }
  0xd2   : > { %670 = vst [vmem:[#allocation1] ss:$9 sm:$0xff] %v534_v10  ;;  %806 = vperm.xlu2 %1100, %v669_v12   ;;  %v558_v55 = vperm.slane %v496_v51, 0  ;;  %v559_v56 = vperm.slane %v496_v51, 1  ;;  %v560_v57 = vperm.slane %v496_v51, 2  ;;  %v561_v59 = vperm.slane %v496_v51, 3 }
  0xd3   : > { %671 = vst [vmem:[#allocation1 + $0x1] ss:$9 sm:$0xff] %v535_v11  ;;  %v562_v61 = vperm.slane %v496_v51, 4  ;;  %v563_v62 = vperm.slane %v496_v51, 5  ;;  %v564_v63 = vperm.slane %v496_v51, 6  ;;  %v565_v0 = vperm.slane %v496_v51, 7 }
  0xd4   : > { %672 = vst [vmem:[#allocation1 + $0x2] ss:$9 sm:$0xff] %v536_v13  ;;  %v566_v6 = vperm.slane %v497_v2, 0  ;;  %v567_v7 = vperm.slane %v497_v2, 1  ;;  %v568_v8 = vperm.slane %v497_v2, 2  ;;  %v569_v10 = vperm.slane %v497_v2, 3 }
  0xd5   : > { %673 = vst [vmem:[#allocation1 + $0x3] ss:$9 sm:$0xff] %v537_v14  ;;  %v466_v11 = vadd.f32 0.1, %v450_v5  ;;  %v570_v12 = vperm.slane %v497_v2, 4  ;;  %v571_v13 = vperm.slane %v497_v2, 5 }
  0xd6   : > { %674 = vst [vmem:[#allocation1 + $0x4] ss:$9 sm:$0xff] %v538_v16  ;;  %v572_v14 = vperm.slane %v497_v2, 6  ;;  %v573_v15 = vperm.slane %v497_v2, 7 }
  0xd7   : > { %675 = vst [vmem:[#allocation1 + $0x5] ss:$9 sm:$0xff] %v539_v17  ;;  %v482_v16 = vsub.f32 0.0, %v466_v11 }
  0xd8   : > { %676 = vst [vmem:[#allocation1 + $0x6] ss:$9 sm:$0xff] %v540_v18  ;;  %v355_v18 = vpop.xlane.xlu2 %354 }
  0xd9   : > { %677 = vst [vmem:[#allocation1 + $0x7] ss:$9 sm:$0xff] %v541_v19  ;;  %v498_v17 = vmax.f32 %v482_v16, 0.0  ;;  %v419_v19 = vpop.xlane.xlu0 %418 }
  0xda   : > { %v451_v20 = vsub.f32 %v355_v18, %v419_v19 }
  0xdb   : > { %v574_v21 = vperm.slane %v498_v17, 0  ;;  %v575_v22 = vperm.slane %v498_v17, 1  ;;  %v576_v23 = vperm.slane %v498_v17, 2  ;;  %v579_v28 = vperm.slane %v498_v17, 5 }
  0xe0   : > { %v678_v26 = vld [vmem:[#allocation1] sm:$0xff]  ;;  %v422_v33 = vpop.xlane.xlu2 %421 }
  0xe1   : > { %679 = vst [vmem:[#allocation1] ss:$9 sm:$0xff] %v542_v25  ;;  %809 = vperm.xlu0 %1101, %v678_v26   ;;  %v577_v25 = vperm.slane %v498_v17, 3  ;;  %v467_v26 = vadd.f32 0.1, %v451_v20 }
  0xe2   : > { %680 = vst [vmem:[#allocation1 + $0x1] ss:$9 sm:$0xff] %v543_v27  ;;  %v578_v27 = vperm.slane %v498_v17, 4 }
  0xe3   : > { %681 = vst [vmem:[#allocation1 + $0x2] ss:$9 sm:$0xff] %v544_v29  ;;  %v580_v29 = vperm.slane %v498_v17, 6 }
  0xe4   : > { %682 = vst [vmem:[#allocation1 + $0x3] ss:$9 sm:$0xff] %v545_v30  ;;  %v581_v30 = vperm.slane %v498_v17, 7 }
  0xe5   : > { %683 = vst [vmem:[#allocation1 + $0x4] ss:$9 sm:$0xff] %v546_v31  ;;  %v483_v31 = vsub.f32 0.0, %v467_v26 }
  0xe6   : > { %684 = vst [vmem:[#allocation1 + $0x5] ss:$9 sm:$0xff] %v547_v32 }
  0xe7   : > { %685 = vst [vmem:[#allocation1 + $0x6] ss:$9 sm:$0xff] %v548_v34  ;;  %v499_v32 = vmax.f32 %v483_v31, 0.0  ;;  %v358_v34 = vpop.xlane.xlu1 %357 }
  0xe8   : > { %686 = vst [vmem:[#allocation1 + $0x7] ss:$9 sm:$0xff] %v549_v35  ;;  %v452_v35 = vsub.f32 %v358_v34, %v422_v33 }
  0xe9   : > { %v582_v36 = vperm.slane %v499_v32, 0  ;;  %v583_v37 = vperm.slane %v499_v32, 1  ;;  %v584_v38 = vperm.slane %v499_v32, 2  ;;  %v589_v45 = vperm.slane %v499_v32, 7 }
  0xef   : > { %v687_v43 = vld [vmem:[#allocation1] sm:$0xff] }
  0xf0   : > { %688 = vst [vmem:[#allocation1] ss:$9 sm:$0xff] %v550_v40  ;;  %812 = vperm.xlu1 %1102, %v687_v43   ;;  %v585_v40 = vperm.slane %v499_v32, 3  ;;  %v587_v43 = vperm.slane %v499_v32, 5 }
  0xf1   : > { %689 = vst [vmem:[#allocation1 + $0x1] ss:$9 sm:$0xff] %v551_v41  ;;  %v468_v41 = vadd.f32 0.1, %v452_v35 }
  0xf2   : > { %690 = vst [vmem:[#allocation1 + $0x2] ss:$9 sm:$0xff] %v552_v42  ;;  %v586_v42 = vperm.slane %v499_v32, 4 }
  0xf3   : > { %691 = vst [vmem:[#allocation1 + $0x3] ss:$9 sm:$0xff] %v553_v44  ;;  %v588_v44 = vperm.slane %v499_v32, 6 }
  0xf4   : > { %692 = vst [vmem:[#allocation1 + $0x4] ss:$9 sm:$0xff] %v554_v46  ;;  %v484_v46 = vsub.f32 0.0, %v468_v41 }
  0xf5   : > { %693 = vst [vmem:[#allocation1 + $0x5] ss:$9 sm:$0xff] %v555_v47 }
  0xf6   : > { %694 = vst [vmem:[#allocation1 + $0x6] ss:$9 sm:$0xff] %v556_v48  ;;  %v500_v47 = vmax.f32 %v484_v46, 0.0  ;;  %v425_v48 = vpop.xlane.xlu1 %424 }
  0xf7   : > { %695 = vst [vmem:[#allocation1 + $0x7] ss:$9 sm:$0xff] %v557_v49  ;;  %v361_v49 = vpop.xlane.xlu0 %360 }
  0xf8   : > { %v453_v50 = vsub.f32 %v361_v49, %v425_v48  ;;  %v590_v51 = vperm.slane %v500_v47, 0  ;;  %v591_v52 = vperm.slane %v500_v47, 1  ;;  %v592_v53 = vperm.slane %v500_v47, 2 }
  0xf9   : > { %v597_v60 = vperm.slane %v500_v47, 7 }
  0xfe   : > { %v696_v58 = vld [vmem:[#allocation1] sm:$0xff] }
  0xff   : > { %697 = vst [vmem:[#allocation1] ss:$9 sm:$0xff] %v558_v55  ;;  %815 = vperm.xlu2 %1100, %v696_v58   ;;  %v593_v55 = vperm.slane %v500_v47, 3  ;;  %v595_v58 = vperm.slane %v500_v47, 5 }
 0x100   : > { %698 = vst [vmem:[#allocation1 + $0x1] ss:$9 sm:$0xff] %v559_v56  ;;  %v469_v56 = vadd.f32 0.1, %v453_v50 }
 0x101   : > { %699 = vst [vmem:[#allocation1 + $0x2] ss:$9 sm:$0xff] %v560_v57  ;;  %v594_v57 = vperm.slane %v500_v47, 4 }
 0x102   : > { %700 = vst [vmem:[#allocation1 + $0x3] ss:$9 sm:$0xff] %v561_v59  ;;  %v596_v59 = vperm.slane %v500_v47, 6 }
 0x103   : > { %701 = vst [vmem:[#allocation1 + $0x4] ss:$9 sm:$0xff] %v562_v61  ;;  %v485_v61 = vsub.f32 0.0, %v469_v56 }
 0x104   : > { %702 = vst [vmem:[#allocation1 + $0x5] ss:$9 sm:$0xff] %v563_v62 }
 0x105   : > { %703 = vst [vmem:[#allocation1 + $0x6] ss:$9 sm:$0xff] %v564_v63  ;;  %v501_v62 = vmax.f32 %v485_v61, 0.0  ;;  %v428_v63 = vpop.xlane.xlu0 %427 }
 0x106   : > { %704 = vst [vmem:[#allocation1 + $0x7] ss:$9 sm:$0xff] %v565_v0  ;;  %v364_v0 = vpop.xlane.xlu2 %363 }
 0x107   : > { %v454_v1 = vsub.f32 %v364_v0, %v428_v63  ;;  %v598_v2 = vperm.slane %v501_v62, 0  ;;  %v599_v3 = vperm.slane %v501_v62, 1  ;;  %v600_v4 = vperm.slane %v501_v62, 2 }
 0x108   : > { %v605_v11 = vperm.slane %v501_v62, 7 }
 0x10d   : > { %v705_v9 = vld [vmem:[#allocation1] sm:$0xff] }
 0x10e   : > { %706 = vst [vmem:[#allocation1] ss:$9 sm:$0xff] %v566_v6  ;;  %818 = vperm.xlu2 %1100, %v705_v9   ;;  %v601_v6 = vperm.slane %v501_v62, 3  ;;  %v603_v9 = vperm.slane %v501_v62, 5 }
 0x10f   : > { %707 = vst [vmem:[#allocation1 + $0x1] ss:$9 sm:$0xff] %v567_v7  ;;  %v470_v7 = vadd.f32 0.1, %v454_v1 }
 0x110   : > { %708 = vst [vmem:[#allocation1 + $0x2] ss:$9 sm:$0xff] %v568_v8  ;;  %v602_v8 = vperm.slane %v501_v62, 4 }
 0x111   : > { %709 = vst [vmem:[#allocation1 + $0x3] ss:$9 sm:$0xff] %v569_v10  ;;  %v604_v10 = vperm.slane %v501_v62, 6 }
 0x112   : > { %710 = vst [vmem:[#allocation1 + $0x4] ss:$9 sm:$0xff] %v570_v12  ;;  %v486_v12 = vsub.f32 0.0, %v470_v7 }
 0x113   : > { %711 = vst [vmem:[#allocation1 + $0x5] ss:$9 sm:$0xff] %v571_v13 }
 0x114   : > { %712 = vst [vmem:[#allocation1 + $0x6] ss:$9 sm:$0xff] %v572_v14  ;;  %v502_v13 = vmax.f32 %v486_v12, 0.0  ;;  %v367_v14 = vpop.xlane.xlu1 %366 }
 0x115   : > { %713 = vst [vmem:[#allocation1 + $0x7] ss:$9 sm:$0xff] %v573_v15  ;;  %v431_v15 = vpop.xlane.xlu2 %430 }
 0x116   : > { %v455_v16 = vsub.f32 %v367_v14, %v431_v15  ;;  %v606_v17 = vperm.slane %v502_v13, 0  ;;  %v607_v18 = vperm.slane %v502_v13, 1  ;;  %v608_v19 = vperm.slane %v502_v13, 2 }
 0x117   : > { %v613_v26 = vperm.slane %v502_v13, 7 }
 0x11c   : > { %v714_v24 = vld [vmem:[#allocation1] sm:$0xff] }
 0x11d   : > { %715 = vst [vmem:[#allocation1] ss:$9 sm:$0xff] %v574_v21  ;;  %821 = vperm.xlu1 %1102, %v714_v24   ;;  %v609_v21 = vperm.slane %v502_v13, 3  ;;  %v611_v24 = vperm.slane %v502_v13, 5 }
 0x11e   : > { %716 = vst [vmem:[#allocation1 + $0x1] ss:$9 sm:$0xff] %v575_v22  ;;  %v471_v22 = vadd.f32 0.1, %v455_v16 }
 0x11f   : > { %717 = vst [vmem:[#allocation1 + $0x2] ss:$9 sm:$0xff] %v576_v23  ;;  %v610_v23 = vperm.slane %v502_v13, 4 }
 0x120   : > { %718 = vst [vmem:[#allocation1 + $0x3] ss:$9 sm:$0xff] %v577_v25  ;;  %v612_v25 = vperm.slane %v502_v13, 6 }
 0x121   : > { %719 = vst [vmem:[#allocation1 + $0x4] ss:$9 sm:$0xff] %v578_v27  ;;  %v487_v27 = vsub.f32 0.0, %v471_v22 }
 0x122   : > { %720 = vst [vmem:[#allocation1 + $0x5] ss:$9 sm:$0xff] %v579_v28 }
 0x123   : > { %721 = vst [vmem:[#allocation1 + $0x6] ss:$9 sm:$0xff] %v580_v29  ;;  %v503_v28 = vmax.f32 %v487_v27, 0.0  ;;  %v434_v29 = vpop.xlane.xlu1 %433 }
 0x124   : > { %722 = vst [vmem:[#allocation1 + $0x7] ss:$9 sm:$0xff] %v581_v30  ;;  %v370_v30 = vpop.xlane.xlu0 %369 }
 0x125   : > { %v456_v31 = vsub.f32 %v370_v30, %v434_v29  ;;  %v614_v32 = vperm.slane %v503_v28, 0  ;;  %v615_v33 = vperm.slane %v503_v28, 1  ;;  %v616_v34 = vperm.slane %v503_v28, 2 }
 0x126   : > { %v621_v41 = vperm.slane %v503_v28, 7 }
 0x12b   : > { %v723_v39 = vld [vmem:[#allocation1] sm:$0xff] }
 0x12c   : > { %724 = vst [vmem:[#allocation1] ss:$9 sm:$0xff] %v582_v36  ;;  %824 = vperm.xlu2 %1100, %v723_v39   ;;  %v617_v36 = vperm.slane %v503_v28, 3  ;;  %v619_v39 = vperm.slane %v503_v28, 5 }
 0x12d   : > { %725 = vst [vmem:[#allocation1 + $0x1] ss:$9 sm:$0xff] %v583_v37  ;;  %v472_v37 = vadd.f32 0.1, %v456_v31 }
 0x12e   : > { %726 = vst [vmem:[#allocation1 + $0x2] ss:$9 sm:$0xff] %v584_v38  ;;  %v618_v38 = vperm.slane %v503_v28, 4 }
 0x12f   : > { %727 = vst [vmem:[#allocation1 + $0x3] ss:$9 sm:$0xff] %v585_v40  ;;  %v620_v40 = vperm.slane %v503_v28, 6 }
 0x130   : > { %728 = vst [vmem:[#allocation1 + $0x4] ss:$9 sm:$0xff] %v586_v42  ;;  %v488_v42 = vsub.f32 0.0, %v472_v37 }
 0x131   : > { %729 = vst [vmem:[#allocation1 + $0x5] ss:$9 sm:$0xff] %v587_v43 }
 0x132   : > { %730 = vst [vmem:[#allocation1 + $0x6] ss:$9 sm:$0xff] %v588_v44  ;;  %v504_v43 = vmax.f32 %v488_v42, 0.0  ;;  %v437_v44 = vpop.xlane.xlu1 %436 }
 0x133   : > { %731 = vst [vmem:[#allocation1 + $0x7] ss:$9 sm:$0xff] %v589_v45  ;;  %v373_v45 = vpop.xlane.xlu2 %372 }
 0x134   : > { %v457_v46 = vsub.f32 %v373_v45, %v437_v44  ;;  %v622_v47 = vperm.slane %v504_v43, 0  ;;  %v623_v48 = vperm.slane %v504_v43, 1  ;;  %v624_v49 = vperm.slane %v504_v43, 2 }
 0x135   : > { %v628_v56 = vperm.slane %v504_v43, 6 }
 0x13a   : > { %v732_v54 = vld [vmem:[#allocation1] sm:$0xff] }
 0x13b   : > { %733 = vst [vmem:[#allocation1] ss:$9 sm:$0xff] %v590_v51  ;;  %827 = vperm.xlu1 %1102, %v732_v54   ;;  %v625_v51 = vperm.slane %v504_v43, 3  ;;  %v626_v54 = vperm.slane %v504_v43, 4 }
 0x13c   : > { %734 = vst [vmem:[#allocation1 + $0x1] ss:$9 sm:$0xff] %v591_v52  ;;  %v376_v52 = vpop.xlane.xlu0 %375 }
 0x13d   : > { %735 = vst [vmem:[#allocation1 + $0x2] ss:$9 sm:$0xff] %v592_v53  ;;  %v473_v53 = vadd.f32 0.1, %v457_v46 }
 0x13e   : > { %736 = vst [vmem:[#allocation1 + $0x3] ss:$9 sm:$0xff] %v593_v55  ;;  %v627_v55 = vperm.slane %v504_v43, 5 }
 0x13f   : > { %737 = vst [vmem:[#allocation1 + $0x4] ss:$9 sm:$0xff] %v594_v57  ;;  %v629_v57 = vperm.slane %v504_v43, 7 }
 0x140   : > { %738 = vst [vmem:[#allocation1 + $0x5] ss:$9 sm:$0xff] %v595_v58  ;;  %v489_v58 = vsub.f32 0.0, %v473_v53 }
 0x141   : > { %739 = vst [vmem:[#allocation1 + $0x6] ss:$9 sm:$0xff] %v596_v59 }
 0x142   : > { %740 = vst [vmem:[#allocation1 + $0x7] ss:$9 sm:$0xff] %v597_v60  ;;  %v505_v59 = vmax.f32 %v489_v58, 0.0 }
 0x144   : > { %v440_v60 = vpop.xlane.xlu0 %439  ;;  %v630_v61 = vperm.slane %v505_v59, 0  ;;  %v631_v62 = vperm.slane %v505_v59, 1  ;;  %v632_v0 = vperm.slane %v505_v59, 2  ;;  %v633_v1 = vperm.slane %v505_v59, 3 }
 0x145   : > { %v458_v63 = vsub.f32 %v376_v52, %v440_v60  ;;  %v637_v7 = vperm.slane %v505_v59, 7 }
 0x149   : > { %v741_v5 = vld [vmem:[#allocation1] sm:$0xff] }
 0x14a   : > { %742 = vst [vmem:[#allocation1] ss:$9 sm:$0xff] %v598_v2  ;;  %830 = vperm.xlu0 %1101, %v741_v5   ;;  %v474_v5 = vadd.f32 0.1, %v458_v63 }
 0x14b   : > { %743 = vst [vmem:[#allocation1 + $0x1] ss:$9 sm:$0xff] %v599_v3  ;;  %v634_v3 = vperm.slane %v505_v59, 4 }
 0x14c   : > { %744 = vst [vmem:[#allocation1 + $0x2] ss:$9 sm:$0xff] %v600_v4  ;;  %v635_v4 = vperm.slane %v505_v59, 5 }
 0x14d   : > { %745 = vst [vmem:[#allocation1 + $0x3] ss:$9 sm:$0xff] %v601_v6  ;;  %v636_v6 = vperm.slane %v505_v59, 6 }
 0x14e   : > { %746 = vst [vmem:[#allocation1 + $0x4] ss:$9 sm:$0xff] %v602_v8  ;;  %v490_v8 = vsub.f32 0.0, %v474_v5 }
 0x14f   : > { %747 = vst [vmem:[#allocation1 + $0x5] ss:$9 sm:$0xff] %v603_v9  ;;  %v443_v9 = vpop.xlane.xlu1 %442 }
 0x150   : > { %748 = vst [vmem:[#allocation1 + $0x6] ss:$9 sm:$0xff] %v604_v10  ;;  %v379_v10 = vpop.xlane.xlu2 %378 }
 0x151   : > { %749 = vst [vmem:[#allocation1 + $0x7] ss:$9 sm:$0xff] %v605_v11  ;;  %v506_v11 = vmax.f32 %v490_v8, 0.0  ;;  %v459_v12 = vsub.f32 %v379_v10, %v443_v9 }
 0x153   : > { %v638_v13 = vperm.slane %v506_v11, 0  ;;  %v639_v14 = vperm.slane %v506_v11, 1  ;;  %v475_v15 = vadd.f32 0.1, %v459_v12  ;;  %v644_v22 = vperm.slane %v506_v11, 6  ;;  %v810_v43 = vpop.permute.xlu0 %809 }
 0x158   : > { %v750_v20 = vld [vmem:[#allocation1] sm:$0xff] }
 0x159   : > { %751 = vst [vmem:[#allocation1] ss:$9 sm:$0xff] %v606_v17  ;;  %833 = vperm.xlu2 %1100, %v750_v20   ;;  %v640_v17 = vperm.slane %v506_v11, 2  ;;  %v643_v20 = vperm.slane %v506_v11, 5 }
 0x15a   : > { %752 = vst [vmem:[#allocation1 + $0x1] ss:$9 sm:$0xff] %v607_v18  ;;  %v641_v18 = vperm.slane %v506_v11, 3 }
 0x15b   : > { %753 = vst [vmem:[#allocation1 + $0x2] ss:$9 sm:$0xff] %v608_v19  ;;  %v642_v19 = vperm.slane %v506_v11, 4 }
 0x15c   : > { %754 = vst [vmem:[#allocation1 + $0x3] ss:$9 sm:$0xff] %v609_v21  ;;  %v491_v21 = vsub.f32 0.0, %v475_v15 }
 0x15d   : > { %755 = vst [vmem:[#allocation1 + $0x4] ss:$9 sm:$0xff] %v610_v23  ;;  %v645_v23 = vperm.slane %v506_v11, 7 }
 0x15e   : > { %756 = vst [vmem:[#allocation1 + $0x5] ss:$9 sm:$0xff] %v611_v24  ;;  %v507_v24 = vmax.f32 %v491_v21, 0.0 }
 0x15f   : > { %757 = vst [vmem:[#allocation1 + $0x6] ss:$9 sm:$0xff] %v612_v25 }
 0x160   : > { %758 = vst [vmem:[#allocation1 + $0x7] ss:$9 sm:$0xff] %v613_v26  ;;  %v646_v25 = vperm.slane %v507_v24, 0  ;;  %v647_v26 = vperm.slane %v507_v24, 1  ;;  %v648_v27 = vperm.slane %v507_v24, 2  ;;  %v649_v28 = vperm.slane %v507_v24, 3 }
 0x161   : > { %v650_v30 = vperm.slane %v507_v24, 4  ;;  %v651_v31 = vperm.slane %v507_v24, 5 }
 0x162   : > { %v813_v37 = vpop.permute.xlu1 %812 }
 0x167   : > { %v759_v35 = vld [vmem:[#allocation1] sm:$0xff] }
 0x168   : > { %760 = vst [vmem:[#allocation1] ss:$9 sm:$0xff] %v614_v32  ;;  %836 = vperm.xlu1 %1102, %v759_v35   ;;  %v652_v32 = vperm.slane %v507_v24, 6  ;;  %v807_v35 = vpop.permute.xlu2 %806 }
 0x169   : > { %761 = vst [vmem:[#allocation1 + $0x1] ss:$9 sm:$0xff] %v615_v33  ;;  %v653_v33 = vperm.slane %v507_v24, 7 }
 0x16a   : > { %762 = vst [vmem:[#allocation1 + $0x2] ss:$9 sm:$0xff] %v616_v34 }
 0x16b   : > { %763 = vst [vmem:[#allocation1 + $0x3] ss:$9 sm:$0xff] %v617_v36 }
 0x16c   : > { %764 = vst [vmem:[#allocation1 + $0x4] ss:$9 sm:$0xff] %v618_v38  ;;  %v853_v38 = vlaneseq }
 0x16d   : > { %765 = vst [vmem:[#allocation1 + $0x5] ss:$9 sm:$0xff] %v619_v39 }
 0x16e   : > { %766 = vst [vmem:[#allocation1 + $0x6] ss:$9 sm:$0xff] %v620_v40  ;;  %v854_v40 = vand.u32 127, %v853_v38 }
 0x16f   : > { %767 = vst [vmem:[#allocation1 + $0x7] ss:$9 sm:$0xff] %v621_v41 }
 0x170   : > { %v816_v36 = vpop.permute.xlu2 %815  ;;  %v856_v42 = vadd.s32 4294967288, %v854_v40  ;;  %v860_v44 = vadd.s32 4294967280, %v854_v40  ;;  %v872_v52 = vadd.s32 4294967256, %v854_v40  ;;  %v868_v53 = vadd.s32 4294967264, %v854_v40 }
 0x171   : > { %v880_v60 = vadd.s32 4294967240, %v854_v40  ;;  %v884_v63 = vadd.s32 4294967232, %v854_v40  ;;  %v896_v8 = vadd.s32 4294967208, %v854_v40  ;;  %v912_v24 = vadd.s32 4294967176, %v854_v40 }
 0x172   : > { %v857_v46 = vperm.slane %v810_v43, %v856_v42 }
 0x176   : > { %v768_v50 = vld [vmem:[#allocation1] sm:$0xff] }
 0x177   : > { %769 = vst [vmem:[#allocation1] ss:$9 sm:$0xff] %v622_v47  ;;  %839 = vperm.xlu0 %1101, %v768_v50   ;;  %v861_v47 = vperm.slane %v813_v37, %v860_v44 }
 0x178   : > { %770 = vst [vmem:[#allocation1 + $0x1] ss:$9 sm:$0xff] %v623_v48  ;;  %v819_v39 = vpop.permute.xlu2 %818  ;;  %v855_v48 = vperm.slane %v807_v35, %v854_v40 }
 0x179   : > { %771 = vst [vmem:[#allocation1 + $0x2] ss:$9 sm:$0xff] %v624_v49  ;;  %v864_v49 = vadd.s32 4294967272, %v854_v40 }
 0x17a   : > { %772 = vst [vmem:[#allocation1 + $0x3] ss:$9 sm:$0xff] %v625_v51  ;;  %v859_v51 = vsel %vm858_vm1, %v857_v46, %v855_v48 }
 0x17b   : > { %773 = vst [vmem:[#allocation1 + $0x4] ss:$9 sm:$0xff] %v626_v54  ;;  %v863_v54 = vsel %vm862_vm2, %v861_v47, %v859_v51 }
 0x17c   : > { %774 = vst [vmem:[#allocation1 + $0x5] ss:$9 sm:$0xff] %v627_v55  ;;  %v865_v55 = vperm.slane %v816_v36, %v864_v49 }
 0x17d   : > { %775 = vst [vmem:[#allocation1 + $0x6] ss:$9 sm:$0xff] %v628_v56 }
 0x17e   : > { %776 = vst [vmem:[#allocation1 + $0x7] ss:$9 sm:$0xff] %v629_v57  ;;  %v867_v58 = vsel %vm866_vm3, %v865_v55, %v863_v54 }
 0x185   : > { %v777_v2 = vld [vmem:[#allocation1] sm:$0xff] }
 0x186   : > { %842 = vperm.xlu2 %1100, %v777_v2   ;;  %778 = vst [vmem:[#allocation1] ss:$9 sm:$0xff] %v630_v61  ;;  %v825_v45 = vpop.permute.xlu2 %824  ;;  %v869_v61 = vperm.slane %v819_v39, %v868_v53 }
 0x187   : > { %779 = vst [vmem:[#allocation1 + $0x1] ss:$9 sm:$0xff] %v631_v62  ;;  %v876_v62 = vadd.s32 4294967248, %v854_v40 }
 0x188   : > { %780 = vst [vmem:[#allocation1 + $0x2] ss:$9 sm:$0xff] %v632_v0  ;;  %v871_v0 = vsel %vm870_vm4, %v869_v61, %v867_v58 }
 0x189   : > { %781 = vst [vmem:[#allocation1 + $0x3] ss:$9 sm:$0xff] %v633_v1 }
 0x18a   : > { %782 = vst [vmem:[#allocation1 + $0x4] ss:$9 sm:$0xff] %v634_v3 }
 0x18b   : > { %783 = vst [vmem:[#allocation1 + $0x5] ss:$9 sm:$0xff] %v635_v4  ;;  %v877_v4 = vperm.slane %v825_v45, %v876_v62 }
 0x18c   : > { %784 = vst [vmem:[#allocation1 + $0x6] ss:$9 sm:$0xff] %v636_v6  ;;  %v892_v6 = vadd.s32 4294967216, %v854_v40 }
 0x18d   : > { %785 = vst [vmem:[#allocation1 + $0x7] ss:$9 sm:$0xff] %v637_v7  ;;  %v888_v7 = vadd.s32 4294967224, %v854_v40 }
 0x18f   : > { %v822_v41 = vpop.permute.xlu1 %821 }
 0x190   : > { %v873_v59 = vperm.slane %v822_v41, %v872_v52 }
 0x192   : > { %v875_v2 = vsel %vm874_vm5, %v873_v59, %v871_v0 }
 0x193   : > { %v879_v9 = vsel %vm878_vm6, %v877_v4, %v875_v2 }
 0x194   : > { %v786_v16 = vld [vmem:[#allocation1] sm:$0xff] }
 0x195   : > { %845 = vperm.xlu1 %1102, %v786_v16   ;;  %787 = vst [vmem:[#allocation1] ss:$9 sm:$0xff] %v638_v13 }
 0x196   : > { %788 = vst [vmem:[#allocation1 + $0x1] ss:$9 sm:$0xff] %v639_v14 }
 0x197   : > { %789 = vst [vmem:[#allocation1 + $0x2] ss:$9 sm:$0xff] %v640_v17  ;;  %v904_v17 = vadd.s32 4294967192, %v854_v40 }
 0x198   : > { %790 = vst [vmem:[#allocation1 + $0x3] ss:$9 sm:$0xff] %v641_v18  ;;  %v900_v18 = vadd.s32 4294967200, %v854_v40 }
 0x199   : > { %791 = vst [vmem:[#allocation1 + $0x4] ss:$9 sm:$0xff] %v642_v19 }
 0x19a   : > { %792 = vst [vmem:[#allocation1 + $0x5] ss:$9 sm:$0xff] %v643_v20 }
 0x19b   : > { %793 = vst [vmem:[#allocation1 + $0x6] ss:$9 sm:$0xff] %v644_v22  ;;  %v908_v22 = vadd.s32 4294967184, %v854_v40 }
 0x19c   : > { %794 = vst [vmem:[#allocation1 + $0x7] ss:$9 sm:$0xff] %v645_v23 }
 0x1a3   : > { %v795_v29 = vld [vmem:[#allocation1] sm:$0xff] }
 0x1a4   : > { %848 = vperm.xlu0 %1101, %v795_v29   ;;  %796 = vst [vmem:[#allocation1] ss:$9 sm:$0xff] %v646_v25 }
 0x1a5   : > { %797 = vst [vmem:[#allocation1 + $0x1] ss:$9 sm:$0xff] %v647_v26 }
 0x1a6   : > { %798 = vst [vmem:[#allocation1 + $0x2] ss:$9 sm:$0xff] %v648_v27 }
 0x1a7   : > { %799 = vst [vmem:[#allocation1 + $0x3] ss:$9 sm:$0xff] %v649_v28  ;;  %v508_v28 = vld [vmem:[%s172_s21] sm:$0x1]  ;;  %s1143_s21 = scalar_lea.hbm %s1142_s14, 1 }
 0x1a8   : > { %800 = vst [vmem:[#allocation1 + $0x4] ss:$9 sm:$0xff] %v650_v30  ;;  %vm509_vm0 = vcmp.eq.s32.totalorder %v508_v28, 0  ;;  %p1144_p0 = scmp.ne.s32.totalorder %s1142_s14, %s1143_s21  ;;  %p1149_p4 = scmp.lt.s32.totalorder %s1147_s16, %s1143_s21 }
 0x1a9   : > { %801 = vst [vmem:[#allocation1 + $0x5] ss:$9 sm:$0xff] %v651_v31 }
 0x1aa   : > { %802 = vst [vmem:[#allocation1 + $0x6] ss:$9 sm:$0xff] %v652_v32  ;;  %p1145_p1 = pnand %p1144_p0, %p1290_p5  ;;  %p1150_p7 = por %p1149_p4, %p1148_p3 }
 0x1ab   : > { %803 = vst [vmem:[#allocation1 + $0x7] ss:$9 sm:$0xff] %v653_v33 }
 0x1ac   : > { %p1146_p2 = pneg %p1145_p1 }
 0x1ad   : > { %v828_v50 = vpop.permute.xlu1 %827 }
 0x1ae   : > { %v881_v3 = vperm.slane %v828_v50, %v880_v60  ;;  %p1151_p8 = pnand %p1150_p7, %p1146_p2 }
 0x1b0   : > { %v883_v12 = vsel %vm882_vm7, %v881_v3, %v879_v9 }
 0x1b2   : > { %v804_v34 = vld [vmem:[#allocation1] sm:$0xff] }
 0x1b3   : > { %851 = vperm.xlu2 %1100, %v804_v34   ;;  %v834_v56 = vpop.permute.xlu2 %833 }
 0x1b4   : > { %v889_v15 = vperm.slane %v834_v56, %v888_v7 }
 0x1bc   : > { %v831_v57 = vpop.permute.xlu0 %830 }
 0x1bd   : > { %v885_v5 = vperm.slane %v831_v57, %v884_v63 }
 0x1bf   : > { %v887_v13 = vsel %vm886_vm8, %v885_v5, %v883_v12 }
 0x1c0   : > { %v891_v20 = vsel %vm890_vm9, %v889_v15, %v887_v13 }
 0x1da   : > { %v837_v1 = vpop.permute.xlu1 %836 }
 0x1db   : > { %v893_v14 = vperm.slane %v837_v1, %v892_v6 }
 0x1dd   : > { %v895_v21 = vsel %vm894_vm10, %v893_v14, %v891_v20 }
 0x1e0   : > { %v843_v10 = vpop.permute.xlu2 %842 }
 0x1e1   : > { %v901_v26 = vperm.slane %v843_v10, %v900_v18 }
 0x1e9   : > { %v840_v11 = vpop.permute.xlu0 %839 }
 0x1ea   : > { %v897_v16 = vperm.slane %v840_v11, %v896_v8 }
 0x1ec   : > { %v899_v23 = vsel %vm898_vm11, %v897_v16, %v895_v21 }
 0x1ed   : > { %v903_v30 = vsel %vm902_vm12, %v901_v26, %v899_v23 }
 0x207   : > { %v846_v19 = vpop.permute.xlu1 %845 }
 0x208   : > { %v905_v25 = vperm.slane %v846_v19, %v904_v17 }
 0x20a   : > { %v907_v33 = vsel %vm906_vm13, %v905_v25, %v903_v30 }
 0x20d   : > { %v852_v27 = vpop.permute.xlu2 %851 }
 0x20e   : > { %v913_v32 = vperm.slane %v852_v27, %v912_v24 }
 0x216   : > { %v849_v29 = vpop.permute.xlu0 %848 }
 0x217   : > { %v909_v31 = vperm.slane %v849_v29, %v908_v22 }
 0x219   : > { %v911_v34 = vsel %vm910_vm14, %v909_v31, %v907_v33 }
 0x21a   : > { %v915_v35 = vsel %vm914_vm15, %v913_v32, %v911_v34 }
 0x21b   : > { %v917_v36 = vsel %vm509_vm0, 0.0, %v915_v35 }
 0x21c   : > { %918 = vst [vmem:[%s1318_s22] sm:$0x1] %v917_v36 }
 0x21d   : > { %1154 = shalt.err (!%p1151_p8)
}
 0x21e   : > { %1042 = dma.vmem_to_hbm [thread:$0]  (%p1290_p5), %s931_s6, 16, %s933_s7, %s920_s1  }
 0x21f PF: > { %p1048_p9 = scmp.ge.s32.totalorder %s1203_s28, 2  ;;  %s944_s11 = sand.u32 1, %s1191_s26  }
 0x220   : > { %s945_s22 = scalar_lea.sflag [#allocation9], %s944_s11 }
 0x221   : > { %p1045_p10 = pnand %p1048_p9, %p1294_p6 }
 0x223   : > { %p1046_p11 = pneg %p1045_p10 }
 0x225   : > { %1186 = dma.done.wait (%p1046_p11), %s945_s22, 16  }
 0x226   : > { %1188 = vsyncadd (%p1046_p11), %s945_s22, 4294967280  ;;  %p28_p12 = scmp.ge.s32.totalorder %s1277_s30, 4   ;;  %s1422_s26 = smov %s1195_s27 }
 0x227   : > { %s1423_s27 = smov %s1199_s0  ;;  %s1424_s0 = smov %s1288_s8 }
 0x228   : > { %s1425_s28 = smov %s1277_s30  ;;  %30 = sbr.rel (!%p28_p12) target bundleno = 10 (0xa), region = 184 }
 0x22d   :  { %950 = vsyncpa [#allocation9], 1 }
 0x22e   :  { %952 = vsyncpa [#allocation9 + $0x1], 1 }
 0x22f   :  { %953 = vsyncmov [#allocation4] }
 0x232   :  { %s954_s28 = vpop.sfrf %953 }
 0x233   :  { %p1040_p5 = scmp.ne.s32.totalorder %s954_s28, 0 }
 0x235   :  { %958 = shalt.err (%p1040_p5)  }
 0x236   :  { %960 = vsyncmov [#allocation4 + $0x1] }
 0x239   :  { %s961_s9 = vpop.sfrf %960 }
 0x23a   :  { %p1041_p6 = scmp.ne.s32.totalorder %s961_s9, 0 }
 0x23c   :  { %965 = shalt.err (%p1041_p6)  }

</bundles_post_ra>
